<compile_context>
chip_gen: v6e
topology: v6e:2x2x1
jax: 0.10.0
libtpu: 0.0.40
codegen_flags: <defaults>
</compile_context>

<pallas_src>
import functools

import jax
import jax.numpy as jnp
from jax.experimental import pallas as pl
from jax.experimental.pallas import tpu as pltpu


def _round_up(a: int, m: int) -> int:
    return (a + m - 1) // m * m


def _ffn_kernel(x_ref, w1_ref, b1_ref, w2_ref, b2_ref, o_ref, acc_ref,
                *, compute_dtype):
    # x_ref:  (tm, d_model)        [native dtype; cast per tile]
    # w1_ref: (d_model, tk_h)      [compute dtype]   chunk j of W1 columns
    # b1_ref: (1, tk_h)            [f32]             chunk j of b1
    # w2_ref: (tk_h, d_model)      [compute dtype]   chunk j of W2 rows
    # b2_ref: (1, d_model)         [f32]
    # acc_ref:(tm, d_model)        [f32]             reduction accumulator
    j = pl.program_id(1)

    @pl.when(j == 0)
    def _init():
        acc_ref[...] = jnp.zeros_like(acc_ref)

    x = x_ref[...].astype(compute_dtype)              # per-tile cast (no wrapper copy)
    h = jnp.dot(x, w1_ref[...], preferred_element_type=jnp.float32)
    h = jnp.maximum(h + b1_ref[...], 0.0)             # bias + relu in f32
    # dropout == identity at inference
    acc_ref[...] += jnp.dot(h.astype(compute_dtype), w2_ref[...],
                            preferred_element_type=jnp.float32)

    @pl.when(j == pl.num_programs(1) - 1)
    def _finish():
        o_ref[...] = (acc_ref[...] + b2_ref[...]).astype(o_ref.dtype)


def positionwise_ffn(x, w1, b1, w2, b2, *, tm=512, tk_hidden=512,
                     compute_dtype=None):
    """y = relu(x @ w1 + b1) @ w2 + b2   (dropout == identity at inference).

    x:  [batch, seq, d_model]
    w1: [d_model, d_hidden]  (== torch linear1.weight.T)
    b1: [d_hidden]
    w2: [d_hidden, d_model]  (== torch linear2.weight.T)
    b2: [d_model]
    compute_dtype: pass jnp.bfloat16 on v6e/v7x for MXU rate (f32 accumulate
                   kept); default keeps x.dtype so reference numerics match.
    """
    batch, seq, d_model = x.shape
    d_hidden = w1.shape[1]
    n = batch * seq

    out_dtype = x.dtype
    w_dtype = jnp.dtype(compute_dtype) if compute_dtype is not None else jnp.dtype(x.dtype)
    x_item = jnp.dtype(x.dtype).itemsize
    o_item = jnp.dtype(out_dtype).itemsize
    w_item = w_dtype.itemsize

    # --- Row tiling: multiple of 8 (or full row count); no row padding. ---
    tm_eff = min(tm, _round_up(n, 8))
    if n >= 16 and pl.cdiv(n, tm_eff) < 2:
        # v7x megacore: give both TensorCores at least one row tile.
        tm_eff = _round_up(pl.cdiv(n, 2), 8)
    n_row_tiles = pl.cdiv(n, tm_eff)

    # --- Hidden (reduction) chunking: 256-aligned for the 2x256 MXU (v6e/v7x),
    # 128 for tiny hidden dims. d_hidden zero-padded up to a chunk multiple so
    # padded hidden units are exactly zero (relu(x@0 + 0) = 0, 0 @ 0 = 0). ---
    align = 256 if d_hidden >= 256 else 128
    tk_eff = min(tk_hidden, _round_up(d_hidden, align))
    d_hidden_p = _round_up(d_hidden, tk_eff)
    n_h_chunks = d_hidden_p // tk_eff

    # --- Operands: activations untouched; only (small) weights cast/padded. ---
    x2d = x.reshape(n, d_model)
    w1p = jnp.pad(w1.astype(w_dtype), ((0, 0), (0, d_hidden_p - d_hidden)))
    w2p = jnp.pad(w2.astype(w_dtype), ((0, d_hidden_p - d_hidden), (0, 0)))
    b1p = jnp.pad(b1.astype(jnp.float32),
                  (0, d_hidden_p - d_hidden)).reshape(1, d_hidden_p)
    b2p = b2.astype(jnp.float32).reshape(1, d_model)

    # --- VMEM budget per TensorCore (double-buffered blocks + scratch). ---
    try:
        vmem_cap = int(pltpu.get_tpu_info().vmem_capacity_bytes)
    except Exception:  # env-detection only; not hiding kernel errors
        vmem_cap = 64 << 20          # conservative (v7x per-TC) fallback
    need = (2 * tm_eff * d_model * x_item            # x row tiles
            + 2 * d_model * tk_eff * w_item          # W1 chunks
            + 2 * tk_eff * d_model * w_item          # W2 chunks
            + 2 * (tk_eff + d_model) * 4             # bias chunks (f32)
            + 2 * tm_eff * d_model * o_item          # output tiles
            + tm_eff * d_model * 4                   # f32 accumulator
            + tm_eff * tk_eff * 4)                   # hidden slab (f32)
    vmem_limit = min(int(1.5 * need) + (4 << 20), vmem_cap - (8 << 20))
    # TODO(synk): if `need` ever exceeds the per-core cap, shrink tm/tk_eff
    # automatically instead of relying on the compiler to reject it.

    flops = 2 * 2 * n * d_model * d_hidden           # two matmuls
    bytes_accessed = (x2d.size * x_item
                      + n * d_model * o_item
                      + (w1p.size + w2p.size) * w_item
                      + (b1p.size + b2p.size) * 4)
    cost = pl.CostEstimate(flops=flops, transcendentals=0,
                           bytes_accessed=int(bytes_accessed))

    kernel = functools.partial(_ffn_kernel, compute_dtype=w_dtype)
    out2d = pl.pallas_call(
        kernel,
        out_shape=jax.ShapeDtypeStruct((n, d_model), out_dtype),
        grid_spec=pltpu.PrefetchScalarGridSpec(
            num_scalar_prefetch=0,
            grid=(n_row_tiles, n_h_chunks),          # reduction axis LAST
            in_specs=[
                pl.BlockSpec((tm_eff, d_model), lambda i, j: (i, 0)),   # x (resident over j)
                pl.BlockSpec((d_model, tk_eff), lambda i, j: (0, j)),   # W1 chunk
                pl.BlockSpec((1, tk_eff), lambda i, j: (0, j)),         # b1 chunk
                pl.BlockSpec((tk_eff, d_model), lambda i, j: (j, 0)),   # W2 chunk
                pl.BlockSpec((1, d_model), lambda i, j: (0, 0)),        # b2
            ],
            out_specs=pl.BlockSpec((tm_eff, d_model), lambda i, j: (i, 0)),
            scratch_shapes=[pltpu.VMEM((tm_eff, d_model), jnp.float32)],
        ),
        compiler_params=pltpu.CompilerParams(
            dimension_semantics=("parallel", "arbitrary"),
            vmem_limit_bytes=vmem_limit,
        ),
        cost_estimate=cost,
    )(x2d, w1p, b1p, w2p, b2p)

    return out2d.reshape(batch, seq, d_model)


def _init_params(key, d_model, d_hidden, dtype=jnp.float32):
    """Deterministic init mimicking nn.Linear (uniform +- 1/sqrt(fan_in))."""
    k1, k2, k3, k4 = jax.random.split(key, 4)
    bound1 = 1.0 / (d_model ** 0.5)
    bound2 = 1.0 / (d_hidden ** 0.5)
    # Stored pre-transposed: [d_in, d_out]
    w1 = jax.random.uniform(k1, (d_model, d_hidden), dtype, -bound1, bound1)
    b1 = jax.random.uniform(k2, (d_hidden,), dtype, -bound1, bound1)
    w2 = jax.random.uniform(k3, (d_hidden, d_model), dtype, -bound2, bound2)
    b2 = jax.random.uniform(k4, (d_model,), dtype, -bound2, bound2)
    return w1, b1, w2, b2


if __name__ == "__main__":
    d_model, d_hidden = 32, 64
    batch, seq = 2, 8

    key = jax.random.PRNGKey(0)
    kx, kp = jax.random.split(key)
    x = jax.random.normal(kx, (batch, seq, d_model), jnp.float32)
    w1, b1, w2, b2 = _init_params(kp, d_model, d_hidden)

    ref = jnp.maximum(x @ w1 + b1, 0.0) @ w2 + b2

    # f32 path (matches the PyTorch reference numerics).
    out = positionwise_ffn(x, w1, b1, w2, b2)
    out = jax.block_until_ready(out)
    assert out.shape == (batch, seq, d_model)
    assert jnp.allclose(out, ref, atol=1e-5, rtol=1e-5), "f32 mismatch vs reference"

    # bf16 compute path (v6e/v7x MXU-friendly), f32 accumulate -> loose tolerance.
    out_bf16 = positionwise_ffn(x, w1, b1, w2, b2, compute_dtype=jnp.bfloat16)
    out_bf16 = jax.block_until_ready(out_bf16)
    assert out_bf16.shape == (batch, seq, d_model)
    assert jnp.allclose(out_bf16, ref, atol=1e-1, rtol=1e-1), "bf16 mismatch vs reference"

    print("KERNEL_OK")
</pallas_src>

<mosaic_0001>
module attributes {stable_mosaic.version = 11 : i64} {
  func.func @_ffn_kernel(%arg0: i32, %arg1: i32, %arg2: memref<8x32xf32, #tpu.memory_space<vmem>>, %arg3: memref<32x128xf32, #tpu.memory_space<vmem>>, %arg4: memref<1x128xf32, #tpu.memory_space<vmem>>, %arg5: memref<128x32xf32, #tpu.memory_space<vmem>>, %arg6: memref<1x32xf32, #tpu.memory_space<vmem>>, %arg7: memref<8x32xf32, #tpu.memory_space<vmem>>, %arg8: memref<8x32xf32, #tpu.memory_space<vmem>>) attributes {dimension_semantics = [#tpu.dimension_semantics<parallel>, #tpu.dimension_semantics<arbitrary>], iteration_bounds = array<i64: 2, 1>, scalar_prefetch = 0 : i64, scratch_operands = 1 : i64, tpu.core_type = #tpu.core_type<tc>, window_params = [{transform_indices = @transform_0, window_bounds = array<i64: 8, 32>}, {transform_indices = @transform_1, window_bounds = array<i64: 32, 128>}, {transform_indices = @transform_2, window_bounds = array<i64: 1, 128>}, {transform_indices = @transform_3, window_bounds = array<i64: 128, 32>}, {pipeline_mode = #tpu.pipeline_mode<synchronous>, transform_indices = @transform_4, window_bounds = array<i64: 1, 32>}, {transform_indices = @transform_5, window_bounds = array<i64: 8, 32>}]} {
    %c0_i32 = arith.constant 0 : i32
    %0 = arith.cmpi eq, %arg1, %c0_i32 : i32
    %1 = arith.extui %0 : i1 to i32
    %c0_i32_0 = arith.constant 0 : i32
    %2 = arith.cmpi ne, %1, %c0_i32_0 : i32
    scf.if %2 {
      %cst_16 = arith.constant 0.000000e+00 : f32
      %19 = vector.broadcast %cst_16 : f32 to vector<8x32xf32>
      %c0_17 = arith.constant 0 : index
      %c0_18 = arith.constant 0 : index
      %20 = vector.load %arg8[%c0_17, %c0_18] : memref<8x32xf32, #tpu.memory_space<vmem>>, vector<8x32xf32>
      tpu.vector_store %arg8[%c0_17, %c0_18], %19 {strides = array<i32>} : memref<8x32xf32, #tpu.memory_space<vmem>>, vector<8x32xf32>,
    } else {
    }
    %c0 = arith.constant 0 : index
    %c0_1 = arith.constant 0 : index
    %3 = vector.load %arg2[%c0, %c0_1] : memref<8x32xf32, #tpu.memory_space<vmem>>, vector<8x32xf32>
    %c0_2 = arith.constant 0 : index
    %c0_3 = arith.constant 0 : index
    %4 = vector.load %arg3[%c0_2, %c0_3] : memref<32x128xf32, #tpu.memory_space<vmem>>, vector<32x128xf32>
    %cst = arith.constant dense<0.000000e+00> : vector<8x128xf32>
    %5 = tpu.matmul %3, %4, %cst {dimension_numbers = #tpu.dot_dimension_numbers<[1], [0], [0], [1], [0, 0, 1, 1], [], []>} : vector<8x32xf32>, vector<32x128xf32>, vector<8x128xf32> -> vector<8x128xf32>
    %c0_4 = arith.constant 0 : index
    %c0_5 = arith.constant 0 : index
    %6 = vector.load %arg4[%c0_4, %c0_5] : memref<1x128xf32, #tpu.memory_space<vmem>>, vector<1x128xf32>
    %7 = vector.broadcast %6 : vector<1x128xf32> to vector<8x128xf32>
    %8 = arith.addf %5, %7 : vector<8x128xf32>
    %cst_6 = arith.constant 0.000000e+00 : f32
    %9 = vector.broadcast %cst_6 : f32 to vector<8x128xf32>
    %10 = arith.maximumf %8, %9 : vector<8x128xf32>
    %c0_7 = arith.constant 0 : index
    %c0_8 = arith.constant 0 : index
    %11 = vector.load %arg8[%c0_7, %c0_8] : memref<8x32xf32, #tpu.memory_space<vmem>>, vector<8x32xf32>
    %c0_9 = arith.constant 0 : index
    %c0_10 = arith.constant 0 : index
    %12 = vector.load %arg5[%c0_9, %c0_10] : memref<128x32xf32, #tpu.memory_space<vmem>>, vector<128x32xf32>
    %cst_11 = arith.constant dense<0.000000e+00> : vector<8x32xf32>
    %13 = tpu.matmul %10, %12, %cst_11 {dimension_numbers = #tpu.dot_dimension_numbers<[1], [0], [0], [1], [0, 0, 1, 1], [], []>} : vector<8x128xf32>, vector<128x32xf32>, vector<8x32xf32> -> vector<8x32xf32>
    %14 = arith.addf %11, %13 : vector<8x32xf32>
    %c0_12 = arith.constant 0 : index
    %c0_13 = arith.constant 0 : index
    %15 = vector.load %arg8[%c0_12, %c0_13] : memref<8x32xf32, #tpu.memory_space<vmem>>, vector<8x32xf32>
    tpu.vector_store %arg8[%c0_12, %c0_13], %14 {strides = array<i32>} : memref<8x32xf32, #tpu.memory_space<vmem>>, vector<8x32xf32>,
    %c0_i32_14 = arith.constant 0 : i32
    %16 = arith.cmpi eq, %arg1, %c0_i32_14 : i32
    %17 = arith.extui %16 : i1 to i32
    %c0_i32_15 = arith.constant 0 : i32
    %18 = arith.cmpi ne, %17, %c0_i32_15 : i32
    scf.if %18 {
      %c0_16 = arith.constant 0 : index
      %c0_17 = arith.constant 0 : index
      %19 = vector.load %arg8[%c0_16, %c0_17] : memref<8x32xf32, #tpu.memory_space<vmem>>, vector<8x32xf32>
      %c0_18 = arith.constant 0 : index
      %c0_19 = arith.constant 0 : index
      %20 = vector.load %arg6[%c0_18, %c0_19] : memref<1x32xf32, #tpu.memory_space<vmem>>, vector<1x32xf32>
      %21 = vector.broadcast %20 : vector<1x32xf32> to vector<8x32xf32>
      %22 = arith.addf %19, %21 : vector<8x32xf32>
      %c0_20 = arith.constant 0 : index
      %c0_21 = arith.constant 0 : index
      %23 = vector.load %arg7[%c0_20, %c0_21] : memref<8x32xf32, #tpu.memory_space<vmem>>, vector<8x32xf32>
      tpu.vector_store %arg7[%c0_20, %c0_21], %22 {strides = array<i32>} : memref<8x32xf32, #tpu.memory_space<vmem>>, vector<8x32xf32>,
    } else {
    }
    return
  }
  func.func @transform_0(%arg0: i32, %arg1: i32) -> (i32, i32) {
    %c0_i32 = arith.constant 0 : i32
    %c0_i32_0 = arith.constant 0 : i32
    return %arg0, %c0_i32 : i32, i32
  }
  func.func @transform_1(%arg0: i32, %arg1: i32) -> (i32, i32) {
    %c0_i32 = arith.constant 0 : i32
    %c0_i32_0 = arith.constant 0 : i32
    return %c0_i32, %arg1 : i32, i32
  }
  func.func @transform_2(%arg0: i32, %arg1: i32) -> (i32, i32) {
    %c0_i32 = arith.constant 0 : i32
    %c0_i32_0 = arith.constant 0 : i32
    return %c0_i32, %arg1 : i32, i32
  }
  func.func @transform_3(%arg0: i32, %arg1: i32) -> (i32, i32) {
    %c0_i32 = arith.constant 0 : i32
    %c0_i32_0 = arith.constant 0 : i32
    return %arg1, %c0_i32 : i32, i32
  }
  func.func @transform_4(%arg0: i32, %arg1: i32) -> (i32, i32) {
    %c0_i32 = arith.constant 0 : i32
    %c0_i32_0 = arith.constant 0 : i32
    %c0_i32_1 = arith.constant 0 : i32
    return %c0_i32, %c0_i32_0 : i32, i32
  }
  func.func @transform_5(%arg0: i32, %arg1: i32) -> (i32, i32) {
    %c0_i32 = arith.constant 0 : i32
    %c0_i32_0 = arith.constant 0 : i32
    return %arg0, %c0_i32 : i32, i32
  }
}

</mosaic_0001>

<bundles_post_ra>
// kernel: tpu_custom_call.1
= control target key start
LH: loop header
LB: loop body
LE: loop exit
PB: predicated region body
PF: predicated region fallthrough
CT: control target
= control target key end

     0   :  { %10 = vsyncpa [#allocation4], 0  ;;  %s1050_s0 = inlined_call_operand.vmem [shape: f32[16,32], index: 0, kind: input, shape index: {}]   ;;  %s1051_s1 = inlined_call_operand.vmem [shape: f32[32,128], index: 1, kind: input, shape index: {}]   ;;  %s1052_s2 = inlined_call_operand.vmem [shape: f32[1,128], index: 2, kind: input, shape index: {}]   ;;  %s1053_s3 = inlined_call_operand.vmem [shape: f32[128,32], index: 3, kind: input, shape index: {}]   ;;  %s1054_s4 = inlined_call_operand.vmem [shape: f32[1,32], index: 4, kind: input, shape index: {}]   ;;  %s1055_s5 = inlined_call_operand.hbm [shape: f32[16,32], index: 5, kind: output, shape index: {}]  }
   0x1   :  { %12 = vsyncpa [#allocation4 + $0x1], 0  ;;  %s856_s18 = smov 0   ;;  %s858_s19 = smov 0  }
   0x2   :  { %s860_s20 = smov 0   ;;  %s862_s21 = smov 0  }
   0x3   :  { %s864_s22 = smov 0   ;;  %s866_s23 = smov 0  }
   0x4 LB: > { %s603_s24 = sadd.s32 4294967295, %s821_s23   ;;  %s604_s25 = sadd.s32 4294967294, %s821_s23   ;;  %s821_s23 = sphi %s866_s23, %s18_s23   ;;  %s817_s22 = sphi %s864_s22, %s1062_s22   ;;  %s813_s21 = sphi %s862_s21, %s1061_s21   ;;  %s809_s20 = sphi %s860_s20, %s1060_s20   ;;  %s805_s19 = sphi %s858_s19, %s1059_s19   ;;  %s801_s18 = sphi %s856_s18, %s1058_s18  }
   0x5   : > { %s30_s26 = sadd.s32 1, %s817_s22  ;;  %s162_s27 = sadd.s32 1, %s809_s20 }
   0x6   : > { %p32_p0 = scmp.ge.s32.totalorder %s30_s26, 2  ;;  %p172_p1 = scmp.ne.s32.totalorder %s809_s20, %s805_s19 }
   0x7   : > { %p173_p2 = scmp.eq.s32.totalorder %s603_s24, 1  ;;  %p178_p3 = scmp.ne.s32.totalorder %s805_s19, %s801_s18 }
   0x8   : > { %s1064_s26 = smov (%p32_p0, %s30_s26), 0  ;;  %p179_p5 = scmp.eq.s32.totalorder %s604_s25, 1 }
   0x9   : > { %p896_p4 = por %p173_p2, %p172_p1  ;;  %s159_s29 = ssub.s32 %s817_s22, %s1064_s26 }
   0xa   : > { %p610_p6 = scmp.ge.s32.totalorder %s821_s23, 1  ;;  %p160_p7 = scmp.eq.s32.totalorder %s159_s29, 0 }
   0xb   : > { %p903_p8 = por %p179_p5, %p178_p3  ;;  %p229_p9 = scmp.lt.s32.totalorder %s821_s23, 3 }
   0xc   : > { %s909_s6 = scalar_select %p160_p7, %s809_s20, %s162_s27  }
   0xd   : > { %p230_p10 = pnand %p610_p6, %p229_p9 }
   0xe   : > { %p268_p11 = scmp.lt.s32.totalorder (!%p230_p10), %s813_s21, 1  ;;  %s265_s9 = sand.u32 (!%p230_p10), 1, %s805_s19  }
   0xf   : > { %233 = sbr.rel (%p230_p10) target bundleno = 444 (0x1bc), region = 40  ;;  %s481_s25 = scalar_lea.sflag (!%p230_p10), [#allocation4], %s265_s9 }
  0x10   : > { %s825_s29 = smov (!%p230_p10), [#allocation3]  }
  0x11   : > { %s749_s7 = sshll.u32 (!%p230_p10), %s825_s29, 4  ;;  %s750_s7 = int_to_ptr.vmem [resolvable:$false] %s749_s7 }
  0x14   : > { %v295_v0 = vld [vmem:[%s1051_s1 + $0x18] sm:$0xff]  ;;  %v823_v1 = vmov 0.0   ;;  %v294_v2 = vld [vmem:[%s1051_s1 + $0x10] sm:$0xff]  ;;  %vm824_vm0 = vmmov 0   ;;  %vm289_vm1 = vcmask 261120   ;;  %s269_s13 = scalar_select %p268_p11, %s813_s21, 1 }
  0x15   : > { %642 = vmatprep.subr.mxu0 %v823_v1  ;;  %650 = vmatprep.mubr.msk.f32.mxu0 %vm824_vm0, %v823_v1  ;;  %v394_v3 = vld [vmem:[%s1053_s3 + $0x78] sm:$0xff]  ;;  %290 = vst.msk [vmem:[#allocation2] sm:$0xff] %vm289_vm1, %v823_v1  ;;  %v393_v4 = vld [vmem:[%s1053_s3 + $0x70] sm:$0xff]  ;;  %v293_v5 = vld [vmem:[%s1051_s1 + $0x8] sm:$0xff] }
  0x16   : > { %643 = vmatpush3.msra.mxu0 %v295_v0  ;;  %653 = vmatprep.subr.mxu1 %v823_v1  ;;  %s612_s24 = sshll.u32 %s269_s13, 3  ;;  %v392_v6 = vld [vmem:[%s1053_s3 + $0x68] sm:$0xff]  ;;  %v292_v7 = vld [vmem:[%s1051_s1] sm:$0xff]  ;;  %v390_v10 = vld [vmem:[%s1053_s3 + $0x58] sm:$0xff]  ;;  %s617_s13 = sshll.u32 %s813_s21, 7 }
  0x17   : > { %644 = vmatprep.subr.mxu0 %v823_v1  ;;  %654 = vmatpush3.msra.mxu1 %v394_v3  ;;  %s271_s10 = scalar_lea.vmem %s1050_s0, %s612_s24  ;;  %v391_v9 = vld [vmem:[%s1053_s3 + $0x60] sm:$0xff]  ;;  %v389_v11 = vld [vmem:[%s1053_s3 + $0x50] sm:$0xff]  ;;  %v388_v12 = vld [vmem:[%s1053_s3 + $0x48] sm:$0xff]  ;;  %s492_s24 = scalar_lea.hbm %s1055_s5, %s617_s13 }
  0x18   : > { %645 = vmatpush3.msra.mxu0 %v294_v2  ;;  %655 = vmatprep.subr.mxu1 %v823_v1  ;;  %v291_v8 = vld [vmem:[%s271_s10] sm:$0xff]  ;;  %v386_v14 = vld [vmem:[%s1053_s3 + $0x38] sm:$0xff]  ;;  %v385_v15 = vld [vmem:[%s1053_s3 + $0x30] sm:$0xff]  ;;  %s611_s10 = sshll.u32 %s265_s9, 3  ;;  %s751_s21 = scalar_lea.vmem %s750_s7, 256 }
  0x19   : > { %646 = vmatprep.subr.mxu0 %v823_v1  ;;  %656 = vmatpush3.msra.mxu1 %v393_v4  ;;  %v387_v13 = vld [vmem:[%s1053_s3 + $0x40] sm:$0xff]  ;;  %v384_v16 = vld [vmem:[%s1053_s3 + $0x28] sm:$0xff]  ;;  %v382_v18 = vld [vmem:[%s1053_s3 + $0x18] sm:$0xff]  ;;  %s267_s14 = scalar_lea.vmem [#allocation3], %s611_s10 }
  0x1a   : > { %647 = vmatpush3.msra.mxu0 %v293_v5  ;;  %657 = vmatprep.subr.mxu1 %v823_v1  ;;  %v383_v17 = vld [vmem:[%s1053_s3 + $0x20] sm:$0xff]  ;;  %v381_v19 = vld [vmem:[%s1053_s3 + $0x10] sm:$0xff]  ;;  %v380_v20 = vld [vmem:[%s1053_s3 + $0x8] sm:$0xff]  ;;  %s494_s15 = sshll.u32 %s267_s14, 4  ;;  %s495_s15 = int_to_ptr.vmem [resolvable:$true] %s494_s15 }
  0x1b   : > { %648 = vmatprep.subr.mxu0 %v823_v1  ;;  %658 = vmatpush3.msra.mxu1 %v392_v6  ;;  %v379_v21 = vld [vmem:[%s1053_s3] sm:$0xff]  ;;  %s745_s27 = scalar_lea.vmem %s495_s15, 128  ;;  %p752_p1 = scmp.lt.s32.totalorder %s495_s15, %s750_s7 }
  0x1c   : > { %649 = vmatpush3.msra.mxu0 %v292_v7  ;;  %659 = vmatprep.subr.mxu1 %v823_v1  ;;  %v613_v22 = vld [vmem:[%s1052_s2] ss:$0 sm:$0xff]  ;;  %p746_p12 = scmp.ne.s32.totalorder %s495_s15, %s745_s27  ;;  %p753_p2 = scmp.lt.s32.totalorder %s751_s21, %s745_s27 }
  0x1d   : > { %651 = vmatmul.mubr.msk.f32.vlgmr.msra.gmra.mxu0 %vm289_vm1, %v291_v8  ;;  %660 = vmatpush3.msra.mxu1 %v391_v9  ;;  %v378_v27 = vld [vmem:[#allocation2] sm:$0xff] }
  0x1e   : > { %661 = vmatprep.subr.mxu1 %v823_v1  ;;  %685 = vmatprep.mubr.msk.f32.mxu1 %vm824_vm0, %v823_v1  ;;  %v615_v31 = vld [vmem:[%s1054_s4] ss:$0 sm:$0xff]  ;;  %p747_p13 = pnand %p746_p12, %p896_p4  ;;  %p754_p3 = por %p753_p2, %p752_p1 }
  0x1f   : > { %662 = vmatpush3.msra.mxu1 %v390_v10 }
  0x20   : > { %663 = vmatprep.subr.mxu1 %v823_v1  ;;  %p748_p0 = pneg %p747_p13 }
  0x21   : > { %664 = vmatpush3.msra.mxu1 %v389_v11 }
  0x22   : > { %665 = vmatprep.subr.mxu1 %v823_v1  ;;  %p755_p5 = pnand %p754_p3, %p748_p0 }
  0x23   : > { %666 = vmatpush3.msra.mxu1 %v388_v12 }
  0x24   : > { %667 = vmatprep.subr.mxu1 %v823_v1 }
  0x25   : > { %668 = vmatpush3.msra.mxu1 %v387_v13 }
  0x26   : > { %669 = vmatprep.subr.mxu1 %v823_v1 }
  0x27   : > { %670 = vmatpush3.msra.mxu1 %v386_v14 }
  0x28   : > { %671 = vmatprep.subr.mxu1 %v823_v1 }
  0x29   : > { %672 = vmatpush3.msra.mxu1 %v385_v15 }
  0x2a   : > { %673 = vmatprep.subr.mxu1 %v823_v1 }
  0x2b   : > { %674 = vmatpush3.msra.mxu1 %v384_v16 }
  0x2c   : > { %675 = vmatprep.subr.mxu1 %v823_v1 }
  0x2d   : > { %676 = vmatpush3.msra.mxu1 %v383_v17 }
  0x2e   : > { %677 = vmatprep.subr.mxu1 %v823_v1 }
  0x2f   : > { %678 = vmatpush3.msra.mxu1 %v382_v18 }
  0x30   : > { %679 = vmatprep.subr.mxu1 %v823_v1 }
  0x31   : > { %680 = vmatpush3.msra.mxu1 %v381_v19 }
  0x32   : > { %681 = vmatprep.subr.mxu1 %v823_v1 }
  0x33   : > { %682 = vmatpush3.msra.mxu1 %v380_v20 }
  0x34   : > { %683 = vmatprep.subr.mxu1 %v823_v1 }
  0x35   : > { %684 = vmatpush3.msra.mxu1 %v379_v21 }
  0xdd   : > { %v373_v23 = vpop.f32.mrf.mxu0 }
  0xde   : > { %v374_v24 = vadd.f32 %v613_v22, %v373_v23 }
  0xdf   : > { %v652_v25 = vpop.f32.mrf.mxu0 }
  0xe0   : > { %v377_v26 = vmax.f32 %v374_v24, 0.0 }
  0xe2   : > { %686 = vmatmul.mubr.f32.vlgmr.msra.gmra.mxu1 %v377_v26 }
 0x1a2   : > { %v461_v28 = vpop.f32.mrf.mxu1 }
 0x1a3   : > { %v465_v29 = vadd.f32 %v461_v28, %v378_v27 }
 0x1a4   : > { %v687_v30 = vpop.f32.mrf.mxu1 }
 0x1a5   : > { %466 = vst.msk [vmem:[#allocation2] sm:$0xff] %vm289_vm1, %v465_v29 }
 0x1ac   : > { %v470_v32 = vld [vmem:[#allocation2] sm:$0xff] }
 0x1ad   : > { %v478_v33 = vadd.f32 %v615_v31, %v470_v32 }
 0x1af   : > { %479 = vst.msk [vmem:[%s267_s14] sm:$0xff] %vm289_vm1, %v478_v33 }
 0x1b0   : > { %758 = shalt.err (!%p755_p5)
}
 0x1b1   : > { %s759_s8 = scalar_lea.hbm %s492_s24, 128  ;;  %s763_s11 = scalar_lea.hbm %s1055_s5, 256 }
 0x1b2   : > { %p760_p6 = scmp.ne.s32.totalorder %s492_s24, %s759_s8  ;;  %p764_p10 = scmp.lt.s32.totalorder %s492_s24, %s1055_s5 }
 0x1b3   : > { %p765_p11 = scmp.lt.s32.totalorder %s763_s11, %s759_s8 }
 0x1b4   : > { %p761_p7 = pnand %p760_p6, %p896_p4 }
 0x1b5   : > { %p766_p12 = por %p765_p11, %p764_p10 }
 0x1b6   : > { %p762_p9 = pneg %p761_p7 }
 0x1b8   : > { %p767_p13 = pnand %p766_p12, %p762_p9 }
 0x1ba   : > { %770 = shalt.err (!%p767_p13)
}
 0x1bb   : > { %688 = dma.vmem_to_hbm [thread:$0]  (%p896_p4), %s495_s15, 128, %s492_s24, %s481_s25  }
 0x1bc PF: > { %p694_p0 = scmp.ge.s32.totalorder %s821_s23, 2  ;;  %s506_s14 = sand.u32 1, %s801_s18  }
 0x1bd   : > { %s507_s16 = scalar_lea.sflag [#allocation4], %s506_s14 }
 0x1be   : > { %p691_p1 = pnand %p694_p0, %p903_p8 }
 0x1c0   : > { %p692_p2 = pneg %p691_p1 }
 0x1c2   : > { %796 = dma.done.wait (%p692_p2), %s507_s16, 128  }
 0x1c3   : > { %798 = vsyncadd (%p692_p2), %s507_s16, 4294967168  ;;  %s18_s23 = sadd.s32 1, %s821_s23   ;;  %s1058_s18 = smov %s805_s19 }
 0x1c4   : > { %p15_p3 = scmp.ge.s32.totalorder %s18_s23, 4   ;;  %s1059_s19 = smov %s809_s20 }
 0x1c5   : > { %s1060_s20 = smov %s909_s6  ;;  %s1061_s21 = smov %s817_s22 }
 0x1c6   : > { %s1062_s22 = smov %s1064_s26  ;;  %17 = sbr.rel (!%p15_p3) target bundleno = 4 (0x4), region = 92 }
 0x1cb   :  { %512 = vsyncpa [#allocation4], 1 }
 0x1cc   :  { %514 = vsyncpa [#allocation4 + $0x1], 1 }

</bundles_post_ra>
